<compile_context>
chip_gen: v6e
topology: v6e:2x2x1
jax: 0.10.0
libtpu: 0.0.40
codegen_flags: <defaults>
</compile_context>

<pallas_src>
import functools

import jax
import jax.numpy as jnp
from jax.experimental import pallas as pl
from jax.experimental.pallas import tpu as pltpu

_NEG = -1e30  # effectively -inf without inf-inf NaN paths; also pads the vocab bias


def _round_up(a, b):
    return (a + b - 1) // b * b


def _lm_target_kernel(x_ref, w_ref, b_ref, tgt_ref, out_ref,
                      m_sc, l_sc, p_sc, *, tile_v):
    j = pl.program_id(1)
    nv = pl.num_programs(1)

    @pl.when(j == 0)
    def _init():
        m_sc[...] = jnp.full(m_sc.shape, _NEG, jnp.float32)   # running max
        l_sc[...] = jnp.zeros(l_sc.shape, jnp.float32)        # running sum of exp
        p_sc[...] = jnp.zeros(p_sc.shape, jnp.float32)        # gathered target logit

    # (TM, TV) logits chunk; bf16 operands, f32 accumulation on the MXU.
    logits = jnp.dot(x_ref[...], w_ref[...],
                     preferred_element_type=jnp.float32) + b_ref[...]

    tgt = tgt_ref[...]  # (TM, 1) int32

    # --- online log-softmax update -------------------------------------------
    chunk_max = jnp.max(logits, axis=-1, keepdims=True)
    m_new = jnp.maximum(m_sc[...], chunk_max)
    alpha = jnp.exp(m_sc[...] - m_new)
    l_sc[...] = alpha * l_sc[...] + jnp.sum(jnp.exp(logits - m_new),
                                            axis=-1, keepdims=True)
    m_sc[...] = m_new

    # gather the target's logit (the target column lies in exactly one chunk)
    col = j * tile_v + jax.lax.broadcasted_iota(jnp.int32, logits.shape, 1)
    p_sc[...] += jnp.sum(jnp.where(col == tgt, logits, 0.0),
                         axis=-1, keepdims=True)

    # --- finalize on the last vocab step --------------------------------------
    @pl.when(j == nv - 1)
    def _finalize():
        lse = m_sc[...] + jnp.log(l_sc[...])            # (TM, 1)
        nll = lse - p_sc[...]                           # -log_softmax[tgt]
        mask = (tgt > 0).astype(jnp.float32)            # (TM, 1); tgt==0 is PAD
        # target is (an) argmax  <=>  its logit equals the global max
        correct = (p_sc[...] == m_sc[...]).astype(jnp.float32) * mask

        num_part = jnp.sum(mask * nll)
        den_part = jnp.sum(mask)
        cor_part = jnp.sum(correct)

        lane = jax.lax.broadcasted_iota(jnp.int32, (8, 128), 1)
        out_ref[0] = jnp.where(
            lane == 0, num_part,
            jnp.where(lane == 1, den_part,
                      jnp.where(lane == 2, cor_part, 0.0)))


@functools.partial(jax.jit, static_argnames=("tile_m", "tile_v", "compute_dtype"))
def lm_target_forward(memory_bank, tgt, weight_t, bias, *,
                      tile_m=256, tile_v=2048,
                      compute_dtype=jnp.bfloat16):
    """memory_bank: (B,S,H); tgt: (B,S) int; weight_t: (H,V) = W^T; bias: (V,)."""
    B, S, H = memory_bank.shape
    V = weight_t.shape[1]
    N = B * S

    # effective tile sizes: MXU/layout aligned, clamped to the (padded) problem
    tile_m = _round_up(min(tile_m, _round_up(N, 8)), 8)
    tile_v = _round_up(min(tile_v, _round_up(V, 128)), 128)
    n_pad = _round_up(N, tile_m)
    v_pad = _round_up(V, tile_v)

    x = memory_bank.reshape(N, H).astype(compute_dtype)
    t = tgt.reshape(N, 1).astype(jnp.int32)
    w = weight_t.astype(compute_dtype)
    b = bias.reshape(1, V).astype(jnp.float32)

    if n_pad != N:
        x = jnp.pad(x, ((0, n_pad - N), (0, 0)))
        t = jnp.pad(t, ((0, n_pad - N), (0, 0)))                 # tgt=0 => masked out
    if v_pad != V:
        w = jnp.pad(w, ((0, 0), (0, v_pad - V)))
        b = jnp.pad(b, ((0, 0), (0, v_pad - V)), constant_values=_NEG)

    num_m = n_pad // tile_m
    num_v = v_pad // tile_v

    kernel = functools.partial(_lm_target_kernel, tile_v=tile_v)

    itemsize = jnp.dtype(compute_dtype).itemsize
    cost = pl.CostEstimate(
        flops=2 * n_pad * H * v_pad,
        transcendentals=n_pad * v_pad,
        bytes_accessed=(n_pad * H * itemsize            # x
                        + num_m * H * v_pad * itemsize  # W streamed per token tile
                        + n_pad * 4                     # targets
                        + num_m * 8 * 128 * 4))         # partial sums

    partials = pl.pallas_call(
        kernel,
        out_shape=jax.ShapeDtypeStruct((num_m, 8, 128), jnp.float32),
        grid_spec=pltpu.PrefetchScalarGridSpec(
            num_scalar_prefetch=0,
            grid=(num_m, num_v),
            in_specs=[
                pl.BlockSpec((tile_m, H), lambda i, j: (i, 0)),   # x (resident over j)
                pl.BlockSpec((H, tile_v), lambda i, j: (0, j)),   # W^T tile (streamed)
                pl.BlockSpec((1, tile_v), lambda i, j: (0, j)),   # bias tile
                pl.BlockSpec((tile_m, 1), lambda i, j: (i, 0)),   # targets
            ],
            out_specs=pl.BlockSpec((1, 8, 128), lambda i, j: (i, 0, 0)),
            scratch_shapes=[pltpu.VMEM((tile_m, 1), jnp.float32),   # running max
                            pltpu.VMEM((tile_m, 1), jnp.float32),   # running exp-sum
                            pltpu.VMEM((tile_m, 1), jnp.float32)],  # picked logit
        ),
        compiler_params=pltpu.CompilerParams(
            dimension_semantics=("parallel", "arbitrary"),
            vmem_limit_bytes=48 * 1024 * 1024),
        cost_estimate=cost,
    )(x, w, b, t)

    numerator = jnp.sum(partials[:, 0, 0])
    mask_sum = jnp.sum(partials[:, 0, 1])
    correct = jnp.sum(partials[:, 0, 2])
    denominator = mask_sum + 1e-6
    loss = numerator / denominator
    return loss, correct, denominator


def _reference(memory_bank, tgt, weight_t, bias, compute_dtype):
    # pure-JAX reference mirroring the PyTorch module (same bf16-cast operands,
    # exact f32 accumulation, so it matches the kernel up to summation order).
    H = memory_bank.shape[-1]
    x = memory_bank.reshape(-1, H).astype(compute_dtype).astype(jnp.float32)
    w = weight_t.astype(compute_dtype).astype(jnp.float32)
    logits = jnp.dot(x, w, precision=jax.lax.Precision.HIGHEST) + bias.astype(jnp.float32)
    logp = jax.nn.log_softmax(logits, axis=-1)
    t = tgt.reshape(-1)
    mask = (t > 0).astype(jnp.float32)
    nll = -jnp.take_along_axis(logp, t[:, None], axis=1)[:, 0]
    numerator = jnp.sum(mask * nll)
    denominator = jnp.sum(mask) + 1e-6
    loss = numerator / denominator
    correct = jnp.sum(mask * (jnp.argmax(logits, axis=-1) == t).astype(jnp.float32))
    return loss, correct, denominator


if __name__ == "__main__":
    # small shapes consistent with the module; chosen so both token- and
    # vocab-tiling (and the padding paths) are exercised:
    #   N = 2*25 = 50 tokens -> padded to 64, 4 token tiles of 16
    #   V = 390              -> padded to 512, 4 vocab tiles of 128
    B, S, H, V = 2, 25, 32, 390
    key = jax.random.PRNGKey(0)
    k1, k2, k3, k4 = jax.random.split(key, 4)

    memory_bank = jax.random.normal(k1, (B, S, H), dtype=jnp.float32)
    tgt = jax.random.randint(k2, (B, S), 0, V, dtype=jnp.int32)         # 0 = pad (masked)
    weight_t = 0.05 * jax.random.normal(k3, (H, V), dtype=jnp.float32)  # (H, V) = W^T
    bias = 0.01 * jax.random.normal(k4, (V,), dtype=jnp.float32)

    loss, correct, denom = lm_target_forward(
        memory_bank, tgt, weight_t, bias,
        tile_m=16, tile_v=128, compute_dtype=jnp.bfloat16)
    jax.block_until_ready((loss, correct, denom))

    ref_loss, ref_correct, ref_denom = _reference(
        memory_bank, tgt, weight_t, bias, jnp.bfloat16)

    assert jnp.allclose(loss, ref_loss, atol=2e-3, rtol=2e-3), (loss, ref_loss)
    assert jnp.allclose(correct, ref_correct), (correct, ref_correct)
    assert jnp.allclose(denom, ref_denom, atol=1e-5), (denom, ref_denom)

    # also exercise the default (large-tile) path once on the same data
    loss2, correct2, denom2 = lm_target_forward(memory_bank, tgt, weight_t, bias)
    jax.block_until_ready((loss2, correct2, denom2))
    assert jnp.allclose(loss2, ref_loss, atol=2e-3, rtol=2e-3), (loss2, ref_loss)
    assert jnp.allclose(correct2, ref_correct), (correct2, ref_correct)
    assert jnp.allclose(denom2, ref_denom, atol=1e-5), (denom2, ref_denom)

    print("KERNEL_OK")
</pallas_src>

<mosaic_0001>
module attributes {stable_mosaic.version = 11 : i64} {
  func.func @_lm_target_kernel(%arg0: i32, %arg1: i32, %arg2: memref<16x32xbf16, #tpu.memory_space<vmem>>, %arg3: memref<32x128xbf16, #tpu.memory_space<vmem>>, %arg4: memref<1x128xf32, #tpu.memory_space<vmem>>, %arg5: memref<16x1xi32, #tpu.memory_space<vmem>>, %arg6: memref<1x8x128xf32, #tpu.memory_space<vmem>>, %arg7: memref<16x1xf32, #tpu.memory_space<vmem>>, %arg8: memref<16x1xf32, #tpu.memory_space<vmem>>, %arg9: memref<16x1xf32, #tpu.memory_space<vmem>>) attributes {dimension_semantics = [#tpu.dimension_semantics<parallel>, #tpu.dimension_semantics<arbitrary>], iteration_bounds = array<i64: 4, 4>, scalar_prefetch = 0 : i64, scratch_operands = 3 : i64, tpu.core_type = #tpu.core_type<tc>, window_params = [{transform_indices = @transform_0, window_bounds = array<i64: 16, 32>}, {transform_indices = @transform_1, window_bounds = array<i64: 32, 128>}, {transform_indices = @transform_2, window_bounds = array<i64: 1, 128>}, {transform_indices = @transform_3, window_bounds = array<i64: 16, 1>}, {transform_indices = @transform_4, window_bounds = array<i64: 1, 8, 128>}]} {
    %c0_i32 = arith.constant 0 : i32
    %0 = arith.cmpi eq, %arg1, %c0_i32 : i32
    %1 = arith.extui %0 : i1 to i32
    %c0_i32_0 = arith.constant 0 : i32
    %2 = arith.cmpi ne, %1, %c0_i32_0 : i32
    scf.if %2 {
      %cst_27 = arith.constant -1.000000e+30 : f32
      %43 = vector.broadcast %cst_27 : f32 to vector<16x1xf32>
      %c0_28 = arith.constant 0 : index
      %c0_29 = arith.constant 0 : index
      %44 = vector.load %arg7[%c0_28, %c0_29] : memref<16x1xf32, #tpu.memory_space<vmem>>, vector<16x1xf32>
      tpu.vector_store %arg7[%c0_28, %c0_29], %43 {strides = array<i32>} : memref<16x1xf32, #tpu.memory_space<vmem>>, vector<16x1xf32>,
      %cst_30 = arith.constant 0.000000e+00 : f32
      %45 = vector.broadcast %cst_30 : f32 to vector<16x1xf32>
      %c0_31 = arith.constant 0 : index
      %c0_32 = arith.constant 0 : index
      %46 = vector.load %arg8[%c0_31, %c0_32] : memref<16x1xf32, #tpu.memory_space<vmem>>, vector<16x1xf32>
      tpu.vector_store %arg8[%c0_31, %c0_32], %45 {strides = array<i32>} : memref<16x1xf32, #tpu.memory_space<vmem>>, vector<16x1xf32>,
      %cst_33 = arith.constant 0.000000e+00 : f32
      %47 = vector.broadcast %cst_33 : f32 to vector<16x1xf32>
      %c0_34 = arith.constant 0 : index
      %c0_35 = arith.constant 0 : index
      %48 = vector.load %arg9[%c0_34, %c0_35] : memref<16x1xf32, #tpu.memory_space<vmem>>, vector<16x1xf32>
      tpu.vector_store %arg9[%c0_34, %c0_35], %47 {strides = array<i32>} : memref<16x1xf32, #tpu.memory_space<vmem>>, vector<16x1xf32>,
    } else {
    }
    %c0 = arith.constant 0 : index
    %c0_1 = arith.constant 0 : index
    %3 = vector.load %arg2[%c0, %c0_1] : memref<16x32xbf16, #tpu.memory_space<vmem>>, vector<16x32xbf16>
    %c0_2 = arith.constant 0 : index
    %c0_3 = arith.constant 0 : index
    %4 = vector.load %arg3[%c0_2, %c0_3] : memref<32x128xbf16, #tpu.memory_space<vmem>>, vector<32x128xbf16>
    %cst = arith.constant dense<0.000000e+00> : vector<16x128xf32>
    %5 = tpu.matmul %3, %4, %cst {dimension_numbers = #tpu.dot_dimension_numbers<[1], [0], [0], [1], [0, 0, 1, 1], [], []>} : vector<16x32xbf16>, vector<32x128xbf16>, vector<16x128xf32> -> vector<16x128xf32>
    %c0_4 = arith.constant 0 : index
    %c0_5 = arith.constant 0 : index
    %6 = vector.load %arg4[%c0_4, %c0_5] : memref<1x128xf32, #tpu.memory_space<vmem>>, vector<1x128xf32>
    %7 = vector.broadcast %6 : vector<1x128xf32> to vector<16x128xf32>
    %8 = arith.addf %5, %7 : vector<16x128xf32>
    %c0_6 = arith.constant 0 : index
    %c0_7 = arith.constant 0 : index
    %9 = vector.load %arg5[%c0_6, %c0_7] : memref<16x1xi32, #tpu.memory_space<vmem>>, vector<16x1xi32>
    %cst_8 = arith.constant dense<0xFF800000> : vector<16xf32>
    %10 = vector.multi_reduction <maximumf>, %8, %cst_8 [1] : vector<16x128xf32> to vector<16xf32>
    %11 = vector.shape_cast %10 : vector<16xf32> to vector<16x1xf32>
    %c0_9 = arith.constant 0 : index
    %c0_10 = arith.constant 0 : index
    %12 = vector.load %arg7[%c0_9, %c0_10] : memref<16x1xf32, #tpu.memory_space<vmem>>, vector<16x1xf32>
    %13 = arith.maximumf %12, %11 : vector<16x1xf32>
    %c0_11 = arith.constant 0 : index
    %c0_12 = arith.constant 0 : index
    %14 = vector.load %arg7[%c0_11, %c0_12] : memref<16x1xf32, #tpu.memory_space<vmem>>, vector<16x1xf32>
    %15 = arith.subf %14, %13 : vector<16x1xf32>
    %16 = math.exp %15 : vector<16x1xf32>
    %c0_13 = arith.constant 0 : index
    %c0_14 = arith.constant 0 : index
    %17 = vector.load %arg8[%c0_13, %c0_14] : memref<16x1xf32, #tpu.memory_space<vmem>>, vector<16x1xf32>
    %18 = arith.mulf %16, %17 : vector<16x1xf32>
    %19 = vector.broadcast %13 : vector<16x1xf32> to vector<16x128xf32>
    %20 = arith.subf %8, %19 : vector<16x128xf32>
    %21 = math.exp %20 : vector<16x128xf32>
    %cst_15 = arith.constant dense<0.000000e+00> : vector<16xf32>
    %22 = vector.multi_reduction <add>, %21, %cst_15 [1] : vector<16x128xf32> to vector<16xf32>
    %23 = vector.shape_cast %22 : vector<16xf32> to vector<16x1xf32>
    %24 = arith.addf %18, %23 : vector<16x1xf32>
    %c0_16 = arith.constant 0 : index
    %c0_17 = arith.constant 0 : index
    %25 = vector.load %arg8[%c0_16, %c0_17] : memref<16x1xf32, #tpu.memory_space<vmem>>, vector<16x1xf32>
    tpu.vector_store %arg8[%c0_16, %c0_17], %24 {strides = array<i32>} : memref<16x1xf32, #tpu.memory_space<vmem>>, vector<16x1xf32>,
    %c0_18 = arith.constant 0 : index
    %c0_19 = arith.constant 0 : index
    %26 = vector.load %arg7[%c0_18, %c0_19] : memref<16x1xf32, #tpu.memory_space<vmem>>, vector<16x1xf32>
    tpu.vector_store %arg7[%c0_18, %c0_19], %13 {strides = array<i32>} : memref<16x1xf32, #tpu.memory_space<vmem>>, vector<16x1xf32>,
    %c128_i32 = arith.constant 128 : i32
    %27 = arith.muli %arg1, %c128_i32 : i32
    %28 = tpu.iota {dimensions = array<i32: 1>} : vector<16x128xi32>
    %29 = vector.broadcast %27 : i32 to vector<16x128xi32>
    %30 = arith.addi %29, %28 : vector<16x128xi32>
    %c0_20 = arith.constant 0 : index
    %c0_21 = arith.constant 0 : index
    %31 = vector.load %arg9[%c0_20, %c0_21] : memref<16x1xf32, #tpu.memory_space<vmem>>, vector<16x1xf32>
    %32 = vector.broadcast %9 : vector<16x1xi32> to vector<16x128xi32>
    %33 = arith.cmpi eq, %30, %32 : vector<16x128xi32>
    %cst_22 = arith.constant 0.000000e+00 : f32
    %34 = vector.broadcast %cst_22 : f32 to vector<16x128xf32>
    %35 = arith.select %33, %8, %34 : vector<16x128xi1>, vector<16x128xf32>
    %cst_23 = arith.constant dense<0.000000e+00> : vector<16xf32>
    %36 = vector.multi_reduction <add>, %35, %cst_23 [1] : vector<16x128xf32> to vector<16xf32>
    %37 = vector.shape_cast %36 : vector<16xf32> to vector<16x1xf32>
    %38 = arith.addf %31, %37 : vector<16x1xf32>
    %c0_24 = arith.constant 0 : index
    %c0_25 = arith.constant 0 : index
    %39 = vector.load %arg9[%c0_24, %c0_25] : memref<16x1xf32, #tpu.memory_space<vmem>>, vector<16x1xf32>
    tpu.vector_store %arg9[%c0_24, %c0_25], %38 {strides = array<i32>} : memref<16x1xf32, #tpu.memory_space<vmem>>, vector<16x1xf32>,
    %c3_i32 = arith.constant 3 : i32
    %40 = arith.cmpi eq, %arg1, %c3_i32 : i32
    %41 = arith.extui %40 : i1 to i32
    %c0_i32_26 = arith.constant 0 : i32
    %42 = arith.cmpi ne, %41, %c0_i32_26 : i32
    scf.if %42 {
      %c0_27 = arith.constant 0 : index
      %c0_28 = arith.constant 0 : index
      %43 = vector.load %arg7[%c0_27, %c0_28] : memref<16x1xf32, #tpu.memory_space<vmem>>, vector<16x1xf32>
      %c0_29 = arith.constant 0 : index
      %c0_30 = arith.constant 0 : index
      %44 = vector.load %arg8[%c0_29, %c0_30] : memref<16x1xf32, #tpu.memory_space<vmem>>, vector<16x1xf32>
      %45 = math.log %44 : vector<16x1xf32>
      %46 = arith.addf %43, %45 : vector<16x1xf32>
      %c0_31 = arith.constant 0 : index
      %c0_32 = arith.constant 0 : index
      %47 = vector.load %arg9[%c0_31, %c0_32] : memref<16x1xf32, #tpu.memory_space<vmem>>, vector<16x1xf32>
      %48 = arith.subf %46, %47 : vector<16x1xf32>
      %c0_i32_33 = arith.constant 0 : i32
      %49 = vector.broadcast %c0_i32_33 : i32 to vector<16x1xi32>
      %50 = arith.cmpi sgt, %9, %49 : vector<16x1xi32>
      %51 = arith.extui %50 : vector<16x1xi1> to vector<16x1xi32>
      %52 = arith.sitofp %51 : vector<16x1xi32> to vector<16x1xf32>
      %c0_34 = arith.constant 0 : index
      %c0_35 = arith.constant 0 : index
      %53 = vector.load %arg9[%c0_34, %c0_35] : memref<16x1xf32, #tpu.memory_space<vmem>>, vector<16x1xf32>
      %c0_36 = arith.constant 0 : index
      %c0_37 = arith.constant 0 : index
      %54 = vector.load %arg7[%c0_36, %c0_37] : memref<16x1xf32, #tpu.memory_space<vmem>>, vector<16x1xf32>
      %55 = arith.cmpf oeq, %53, %54 : vector<16x1xf32>
      %56 = arith.extui %55 : vector<16x1xi1> to vector<16x1xi32>
      %57 = arith.sitofp %56 : vector<16x1xi32> to vector<16x1xf32>
      %58 = arith.mulf %57, %52 : vector<16x1xf32>
      %59 = arith.mulf %52, %48 : vector<16x1xf32>
      %60 = vector.shape_cast %59 : vector<16x1xf32> to vector<1x16x1xf32>
      %cst_38 = arith.constant dense<0.000000e+00> : vector<1xf32>
      %61 = vector.multi_reduction <add>, %60, %cst_38 [1, 2] : vector<1x16x1xf32> to vector<1xf32>
      %62 = vector.shape_cast %61 : vector<1xf32> to vector<1x1x1xf32>
      %63 = vector.extract %62[0, 0, 0] : f32 from vector<1x1x1xf32>
      %64 = vector.shape_cast %52 : vector<16x1xf32> to vector<1x16x1xf32>
      %cst_39 = arith.constant dense<0.000000e+00> : vector<1xf32>
      %65 = vector.multi_reduction <add>, %64, %cst_39 [1, 2] : vector<1x16x1xf32> to vector<1xf32>
      %66 = vector.shape_cast %65 : vector<1xf32> to vector<1x1x1xf32>
      %67 = vector.extract %66[0, 0, 0] : f32 from vector<1x1x1xf32>
      %68 = vector.shape_cast %58 : vector<16x1xf32> to vector<1x16x1xf32>
      %cst_40 = arith.constant dense<0.000000e+00> : vector<1xf32>
      %69 = vector.multi_reduction <add>, %68, %cst_40 [1, 2] : vector<1x16x1xf32> to vector<1xf32>
      %70 = vector.shape_cast %69 : vector<1xf32> to vector<1x1x1xf32>
      %71 = vector.extract %70[0, 0, 0] : f32 from vector<1x1x1xf32>
      %72 = tpu.iota {dimensions = array<i32: 1>} : vector<8x128xi32>
      %c0_i32_41 = arith.constant 0 : i32
      %73 = vector.broadcast %c0_i32_41 : i32 to vector<8x128xi32>
      %74 = arith.cmpi eq, %72, %73 : vector<8x128xi32>
      %c1_i32 = arith.constant 1 : i32
      %75 = vector.broadcast %c1_i32 : i32 to vector<8x128xi32>
      %76 = arith.cmpi eq, %72, %75 : vector<8x128xi32>
      %c2_i32 = arith.constant 2 : i32
      %77 = vector.broadcast %c2_i32 : i32 to vector<8x128xi32>
      %78 = arith.cmpi eq, %72, %77 : vector<8x128xi32>
      %cst_42 = arith.constant 0.000000e+00 : f32
      %79 = vector.broadcast %71 : f32 to vector<8x128xf32>
      %80 = vector.broadcast %cst_42 : f32 to vector<8x128xf32>
      %81 = arith.select %78, %79, %80 : vector<8x128xi1>, vector<8x128xf32>
      %82 = vector.broadcast %67 : f32 to vector<8x128xf32>
      %83 = arith.select %76, %82, %81 : vector<8x128xi1>, vector<8x128xf32>
      %84 = vector.broadcast %63 : f32 to vector<8x128xf32>
      %85 = arith.select %74, %84, %83 : vector<8x128xi1>, vector<8x128xf32>
      %c0_43 = arith.constant 0 : index
      %c0_44 = arith.constant 0 : index
      %c0_45 = arith.constant 0 : index
      %86 = vector.load %arg6[%c0_43, %c0_44, %c0_45] : memref<1x8x128xf32, #tpu.memory_space<vmem>>, vector<1x8x128xf32>
      %87 = vector.shape_cast %86 : vector<1x8x128xf32> to vector<8x128xf32>
      %88 = vector.shape_cast %85 : vector<8x128xf32> to vector<1x8x128xf32>
      tpu.vector_store %arg6[%c0_43, %c0_44, %c0_45], %88 {strides = array<i32>} : memref<1x8x128xf32, #tpu.memory_space<vmem>>, vector<1x8x128xf32>,
    } else {
    }
    return
  }
  func.func @transform_0(%arg0: i32, %arg1: i32) -> (i32, i32) {
    %c0_i32 = arith.constant 0 : i32
    %c0_i32_0 = arith.constant 0 : i32
    return %arg0, %c0_i32 : i32, i32
  }
  func.func @transform_1(%arg0: i32, %arg1: i32) -> (i32, i32) {
    %c0_i32 = arith.constant 0 : i32
    %c0_i32_0 = arith.constant 0 : i32
    return %c0_i32, %arg1 : i32, i32
  }
  func.func @transform_2(%arg0: i32, %arg1: i32) -> (i32, i32) {
    %c0_i32 = arith.constant 0 : i32
    %c0_i32_0 = arith.constant 0 : i32
    return %c0_i32, %arg1 : i32, i32
  }
  func.func @transform_3(%arg0: i32, %arg1: i32) -> (i32, i32) {
    %c0_i32 = arith.constant 0 : i32
    %c0_i32_0 = arith.constant 0 : i32
    return %arg0, %c0_i32 : i32, i32
  }
  func.func @transform_4(%arg0: i32, %arg1: i32) -> (i32, i32, i32) {
    %c0_i32 = arith.constant 0 : i32
    %c0_i32_0 = arith.constant 0 : i32
    %c0_i32_1 = arith.constant 0 : i32
    return %arg0, %c0_i32, %c0_i32_0 : i32, i32, i32
  }
}

</mosaic_0001>

<bundles_post_ra>
// kernel: lm_target_forward.1
= control target key start
LH: loop header
LB: loop body
LE: loop exit
PB: predicated region body
PF: predicated region fallthrough
CT: control target
= control target key end

     0   :  { %s1014_s0 = inlined_call_operand.vmem [shape: bf16[64,32], index: 0, kind: input, shape index: {}]   ;;  %s1015_s1 = inlined_call_operand.vmem [shape: bf16[32,512], index: 1, kind: input, shape index: {}]   ;;  %s1016_s2 = inlined_call_operand.vmem [shape: f32[1,512], index: 2, kind: input, shape index: {}]   ;;  %s1017_s3 = inlined_call_operand.vmem [shape: s32[64,1], index: 3, kind: input, shape index: {}]   ;;  %s1018_s4 = inlined_call_operand.vmem [shape: f32[4,8,128], index: 4, kind: output, shape index: {}]  }
   0x1   :  { %1019 = sst [smem:[#allocation6_spill]] %s1015_s1 }
   0x2   :  { %s873_s15 = smov 0   ;;  %s875_s16 = smov 0  }
   0x3   :  { %s877_s17 = smov 0   ;;  %s879_s18 = smov 0  }
   0x4   :  { %s881_s19 = smov 0   ;;  %s883_s20 = smov 0  }
   0x5   :  { %s885_s21 = smov 0  }
   0x6 LB: > { %s23_s22 = sadd.s32 1, %s832_s19  ;;  %s26_s23 = sadd.s32 1, %s836_s20  ;;  %s840_s21 = sphi %s885_s21, %s14_s21   ;;  %s836_s20 = sphi %s883_s20, %s1026_s20   ;;  %s832_s19 = sphi %s881_s19, %s1025_s19   ;;  %s828_s18 = sphi %s879_s18, %s1024_s18   ;;  %s824_s17 = sphi %s877_s17, %s1023_s17   ;;  %s820_s16 = sphi %s875_s16, %s1022_s16   ;;  %s816_s15 = sphi %s873_s15, %s1021_s15  }
   0x7   : > { %p24_p0 = scmp.ge.s32.totalorder %s23_s22, 4  ;;  %s59_s24 = sadd.s32 1, %s820_s16 }
   0x8   : > { %p66_p1 = scmp.ne.s32.totalorder %s820_s16, %s816_s15  ;;  %p67_p2 = scmp.eq.s32.totalorder %s840_s21, 0 }
   0x9   : > { %s1028_s22 = smov (%p24_p0, %s23_s22), 0  ;;  %s1030_s23 = smov (!%p24_p0, %s26_s23), %s836_s20 }
   0xa   : > { %s56_s25 = ssub.s32 %s832_s19, %s1028_s22  ;;  %p68_p3 = por %p67_p2, %p66_p1 }
   0xb   : > { %p28_p4 = scmp.ge.s32.totalorder %s1030_s23, 4  ;;  %p57_p5 = scmp.eq.s32.totalorder %s56_s25, 0 }
   0xc   : > { %p666_p6 = scmp.ge.s32.totalorder %s840_s21, 16 }
   0xd   : > { %s1032_s23 = smov (%p28_p4, %s1030_s23), 0 }
   0xe   : > { %s922_s26 = scalar_select %p57_p5, %s820_s16, %s59_s24  }
   0xf   : > { %170 = sbr.rel (%p666_p6) target bundleno = 33 (0x21), region = 16 }
  0x14   : > { %182 = sbr.rel (!%p68_p3) target bundleno = 33 (0x21), region = 24  ;;  %s184_s27 = sand.u32 (%p68_p3), 1, %s820_s16  }
  0x15   : > { %s668_s28 = sshll.u32 (%p68_p3), %s832_s19, 2  ;;  %s667_s29 = sshll.u32 (%p68_p3), %s184_s27, 4 }
  0x16   : > { %s1020_s1 = sld [smem:[#allocation6_spill]] (%p68_p3)  ;;  %s186_s7 = scalar_lea.vmem (%p68_p3), [#allocation5], %s667_s29 }
  0x1c   : > { %s188_s6 = scalar_lea.vmem %s1020_s1, %s668_s28 }
  0x1d   : > { %v205_v0 = vld [vmem:[%s188_s6] sm:$0xf]  ;;  %v207_v1 = vld [vmem:[%s188_s6 + $0x10] sm:$0xf] }
  0x1e   : > { %206 = vst [vmem:[%s186_s7] sm:$0xf] %v205_v0  ;;  %208 = vst [vmem:[%s186_s7 + $0x4] sm:$0xf] %v207_v1  ;;  %v209_v2 = vld [vmem:[%s188_s6 + $0x20] sm:$0xf] }
  0x1f   : > { %v211_v3 = vld [vmem:[%s188_s6 + $0x30] sm:$0xf]  ;;  %210 = vst [vmem:[%s186_s7 + $0x8] sm:$0xf] %v209_v2 }
  0x20   : > { %212 = vst [vmem:[%s186_s7 + $0xc] sm:$0xf] %v211_v3 }
  0x21 PF: > { %p669_p7 = scmp.ge.s32.totalorder %s840_s21, 1  ;;  %p258_p8 = scmp.lt.s32.totalorder %s840_s21, 17 }
  0x23   : > { %p259_p9 = pnand %p669_p7, %p258_p8 }
  0x24   : > { %s265_s8 = sand.u32 (!%p259_p9), 1, %s816_s15   ;;  %s671_s9 = sshll.u32 (!%p259_p9), %s828_s18, 1 }
  0x25   : > { %262 = sbr.rel (%p259_p9) target bundleno = 929 (0x3a1), region = 73  ;;  %s934_s10 = sshll.u32 (!%p259_p9), %s265_s8, 4 }
  0x26   : > { %p303_p10 = scmp.lt.s32.totalorder (!%p259_p9), %s671_s9, 7  ;;  %p308_p11 = scmp.lt.s32.totalorder (!%p259_p9), %s824_s17, 3 }
  0x27   : > { %p317_p12 = scmp.lt.s32.totalorder (!%p259_p9), %s828_s18, 3  ;;  %s267_s1 = scalar_lea.vmem (!%p259_p9), [#allocation5], %s934_s10 }
  0x28   : > { %p676_p13 = scmp.ne.s32.totalorder (!%p259_p9), %s824_s17, 0 }
  0x2a   : > { %s1034_s9 = smov (!%p303_p10, %s671_s9), 7  ;;  %s1036_s18 = smov (!%p317_p12, %s828_s18), 3 }
  0x2b   : > { %s938_s11 = scalar_select %p308_p11, %s824_s17, 3 }
  0x2c   : > { %s672_s12 = sshll.u32 %s1034_s9, 2  ;;  %s674_s13 = sshll.u32 %s1034_s9, 3 }
  0x2d   : > { %s306_s25 = scalar_lea.vmem %s1014_s0, %s672_s12  ;;  %s310_s15 = scalar_lea.vmem %s1016_s2, %s938_s11 }
  0x2e   : > { %s950_s5 = scalar_lea.vmem %s1017_s3, %s674_s13  ;;  %s675_s6 = sshll.u32 %s1036_s18, 3 }
  0x2f   : > { %s957_s9 = scalar_lea.vmem %s1018_s4, %s675_s6  ;;  %325 = sbr.rel (%p676_p13) target bundleno = 56 (0x38), region = 81 }
  0x34   : > { %vm326_vm0 = vcmask 7168   ;;  %v842_v4 = vmov -1e+30   ;;  %v843_v5 = vmov 0.0  }
  0x35   : > { %327 = vst.msk [vmem:[#allocation2] sm:$0xff] %vm326_vm0, %v842_v4  ;;  %328 = vst.msk [vmem:[#allocation2 + $0x8] sm:$0xff] %vm326_vm0, %v842_v4 }
  0x36   : > { %329 = vst.msk [vmem:[#allocation3] sm:$0xff] %vm326_vm0, %v843_v5  ;;  %330 = vst.msk [vmem:[#allocation3 + $0x8] sm:$0xff] %vm326_vm0, %v843_v5 }
  0x37   : > { %331 = vst.msk [vmem:[#allocation4] sm:$0xff] %vm326_vm0, %v843_v5  ;;  %332 = vst.msk [vmem:[#allocation4 + $0x8] sm:$0xff] %vm326_vm0, %v843_v5 }
  0x38 PF: > { %v771_v6 = vld [vmem:[%s267_s1 + $0x8] sm:$0xff]   ;;  %v844_v7 = vmov 0.0   ;;  %v772_v8 = vld [vmem:[%s267_s1] sm:$0xff]   ;;  %vm845_vm1 = vmmov 0   ;;  %vm363_vm2 = vcmask 261120   ;;  %v846_v10 = vmov 0  }
  0x39   : > { %693 = vmatprep.subr.bf16.mxu0 %v844_v7  ;;  %697 = vmatprep.mubr.msk.bf16.mxu0 %vm845_vm1, %v844_v7  ;;  %v773_v9 = vld [vmem:[%s306_s25] sm:$0xff]   ;;  %vm450_vm3 = vcmask 7168   ;;  %v456_v22 = vlaneseq  ;;  %s682_s1 = sshll.u32 %s824_s17, 7  ;;  %v409_v30 = vld [vmem:[%s950_s5 + $0x8] sm:$0xff]  ;;  %p683_p0 = scmp.ne.s32.totalorder %s824_s17, 3 }
  0x3a   : > { %694 = vmatpush3.bf16.msra.mxu0 %v771_v6  ;;  %770 = vset.pattern.permute.xlu0 %v846_v10  ;;  %v677_v11 = vld [vmem:[%s310_s15] ss:$0 sm:$0xff]  ;;  %v458_v28 = vstv %s682_s1 }
  0x3b   : > { %695 = vmatprep.subr.bf16.mxu0 %v844_v7  ;;  %769 = vset.pattern.permute.xlu1 %v846_v10  ;;  %v967_v18 = vld [vmem:[%s950_s5] sm:$0xff]  ;;  %v972_v27 = vand.u32 127, %v456_v22 }
  0x3c   : > { %v414_v19 = vld [vmem:[#allocation2] sm:$0xff]  ;;  %v415_v23 = vld [vmem:[#allocation2 + $0x8] sm:$0xff] }
  0x3d   : > { %v459_v31 = vadd.s32 %v458_v28, %v972_v27  ;;  %v424_v50 = vld [vmem:[#allocation3] sm:$0xff]  ;;  %v425_v54 = vld [vmem:[#allocation3 + $0x8] sm:$0xff] }
  0x3e   : > { %696 = vmatpush3.bf16.msra.mxu0 %v772_v8  ;;  %v460_v43 = vld [vmem:[#allocation4] sm:$0xff]  ;;  %v461_v59 = vld [vmem:[#allocation4 + $0x8] sm:$0xff] }
  0x41   : > { %698 = vmatmul.mubr.msk.bf16.vlgmr.msra.gmra.mxu0 %vm363_vm2, %v773_v9 }
 0x101   : > { %v401_v12 = vpop.f32.mrf.mxu0 }
 0x102   : > { %v402_v13 = vadd.f32 %v677_v11, %v401_v12 }
 0x103   : > { %v699_v14 = vpop.f32.mrf.mxu0 }
 0x104   : > { %410 = vmax.xlane.f32.xlu0 %v402_v13 }
 0x105   : > { %v404_v15 = vpop.f32.mrf.mxu0 }
 0x106   : > { %v405_v16 = vadd.f32 %v677_v11, %v404_v15 }
 0x107   : > { %v700_v17 = vpop.f32.mrf.mxu0 }
 0x108   : > { %412 = vmax.xlane.f32.xlu0 %v405_v16 }
 0x11e   : > { %463 = vperm.xlu0 %770, %v967_v18  }
 0x18d   : > { %v411_v20 = vpop.xlane.xlu0 %410 }
 0x18e   : > { %v416_v21 = vmax.f32 %v414_v19, %v411_v20 }
 0x190   : > { %v418_v24 = vsub.f32 %v414_v19, %v416_v21  ;;  %453 = vst.msk [vmem:[#allocation2] sm:$0xff] %vm450_vm3, %v416_v21  ;;  %430 = vperm.xlu1 %769, %v416_v21  }
 0x191   : > { %v413_v25 = vpop.xlane.xlu0 %412 }
 0x192   : > { %v417_v26 = vmax.f32 %v415_v23, %v413_v25  ;;  %v420_v47 = vmul.f32 1.442695, %v418_v24 }
 0x194   : > { %v419_v29 = vsub.f32 %v415_v23, %v417_v26  ;;  %454 = vst.msk [vmem:[#allocation2 + $0x8] sm:$0xff] %vm450_vm3, %v417_v26  ;;  %435 = vperm.xlu1 %769, %v417_v26  }
 0x196   : > { %v422_v48 = vmul.f32 1.442695, %v419_v29 }
 0x198   : > { %466 = vperm.xlu1 %769, %v409_v30  }
 0x199   : > { %v464_v32 = vpop.permute.xlu0 %463 }
 0x19a   : > { %vm468_vm4 = vcmp.eq.s32.totalorder %v459_v31, %v464_v32 }
 0x19b   : > { %v470_v33 = vsel %vm468_vm4, %v402_v13, 0.0 }
 0x19c   : > { %472 = vadd.xlane.f32.xlu0 %v470_v33 }
 0x20b   : > { %v431_v34 = vpop.permute.xlu1 %430 }
 0x20c   : > { %v438_v35 = vsub.f32 %v402_v13, %v431_v34 }
 0x20e   : > { %v440_v36 = vmul.f32 1.442695, %v438_v35 }
 0x20f   : > { %v436_v37 = vpop.permute.xlu1 %435 }
 0x210   : > { %774 = vpow2.f32 %v440_v36  ;;  %v439_v38 = vsub.f32 %v405_v16, %v436_v37 }
 0x212   : > { %v442_v39 = vmul.f32 1.442695, %v439_v38 }
 0x213   : > { %v467_v41 = vpop.permute.xlu1 %466 }
 0x214   : > { %776 = vpow2.f32 %v442_v39  ;;  %vm469_vm5 = vcmp.eq.s32.totalorder %v459_v31, %v467_v41 }
 0x215   : > { %v471_v45 = vsel %vm469_vm5, %v405_v16, 0.0  ;;  %778 = vpow2.f32 %v420_v47 }
 0x216   : > { %780 = vpow2.f32 %v422_v48 }
 0x21d   : > { %v775_v40 = vpop.eup %774 }
 0x21e   : > { %444 = vadd.xlane.f32.xlu1 %v775_v40 }
 0x221   : > { %v777_v42 = vpop.eup %776 }
 0x222   : > { %446 = vadd.xlane.f32.xlu1 %v777_v42  ;;  %v779_v49 = vpop.eup %778 }
 0x223   : > { %v426_v51 = vmul.f32 %v779_v49, %v424_v50  ;;  %v781_v52 = vpop.eup %780 }
 0x224   : > { %v427_v56 = vmul.f32 %v781_v52, %v425_v54 }
 0x225   : > { %v473_v44 = vpop.xlane.xlu0 %472 }
 0x226   : > { %v476_v46 = vadd.f32 %v473_v44, %v460_v43  ;;  %474 = vadd.xlane.f32.xlu1 %v471_v45 }
 0x228   : > { %478 = vst.msk [vmem:[#allocation4] sm:$0xff] %vm450_vm3, %v476_v46 }
 0x2a7   : > { %v445_v53 = vpop.xlane.xlu1 %444 }
 0x2a8   : > { %v448_v55 = vadd.f32 %v445_v53, %v426_v51 }
 0x2aa   : > { %451 = vst.msk [vmem:[#allocation3] sm:$0xff] %vm450_vm3, %v448_v55 }
 0x2ab   : > { %v447_v57 = vpop.xlane.xlu1 %446 }
 0x2ac   : > { %v449_v58 = vadd.f32 %v447_v57, %v427_v56 }
 0x2ae   : > { %452 = vst.msk [vmem:[#allocation3 + $0x8] sm:$0xff] %vm450_vm3, %v449_v58  ;;  %483 = sbr.rel (%p683_p0) target bundleno = 929 (0x3a1), region = 85 }
 0x2af   : > { %v475_v60 = vpop.xlane.xlu1 %474 }
 0x2b0   : > { %v477_v61 = vadd.f32 %v475_v60, %v461_v59 }
 0x2b2   : > { %479 = vst.msk [vmem:[#allocation4 + $0x8] sm:$0xff] %vm450_vm3, %v477_v61 }
 0x2b3   : > { %v484_v62 = vld [vmem:[#allocation2] sm:$0xff]  ;;  %v485_v63 = vld [vmem:[#allocation2 + $0x8] sm:$0xff]  ;;  %vm498_vm6 = vcmp.gt.s32.totalorder %v967_v18, 0  ;;  %vm499_vm7 = vcmp.gt.s32.totalorder %v409_v30, 0  ;;  %v847_v2 = vmov 0.0   ;;  %v486_v5 = vld [vmem:[#allocation3] sm:$0xff] }
 0x2b4   : > { %v494_v0 = vld [vmem:[#allocation4] sm:$0xff]  ;;  %v684_v3 = vsel %vm498_vm6, 1.0, %v847_v2  ;;  %v685_v4 = vsel %vm499_vm7, 1.0, %v847_v2  ;;  %782 = vlog2.f32 %v486_v5  ;;  %vm552_vm10 = vcmp.eq.s32.totalorder %v972_v27, 2 }
 0x2b5   : > { %vm504_vm8 = vcmp.eq.f32.partialorder %v494_v0, %v484_v62  ;;  %v487_v6 = vld [vmem:[#allocation3 + $0x8] sm:$0xff]  ;;  %v526_v26 = vsel %vm450_vm3, %v684_v3, 0.0  ;;  %v527_v28 = vsel %vm450_vm3, %v685_v4, 0.0  ;;  %vm551_vm11 = vcmp.eq.s32.totalorder %v972_v27, 1 }
 0x2b6   : > { %v686_v7 = vsel %vm504_vm8, 1.0, %v847_v2  ;;  %784 = vlog2.f32 %v487_v6  ;;  %v528_v30 = vadd.f32 %v527_v28, %v526_v26  ;;  %vm550_vm12 = vcmp.eq.s32.totalorder %v972_v27, 0 }
 0x2b7   : > { %v510_v9 = vmul.f32 %v686_v7, %v684_v3 }
 0x2b9   : > { %v495_v1 = vld [vmem:[#allocation4 + $0x8] sm:$0xff]  ;;  %v538_v11 = vsel %vm450_vm3, %v510_v9, 0.0 }
 0x2ba   : > { %vm505_vm9 = vcmp.eq.f32.partialorder %v495_v1, %v485_v63 }
 0x2bb   : > { %v687_v8 = vsel %vm505_vm9, 1.0, %v847_v2 }
 0x2bc   : > { %v511_v10 = vmul.f32 %v687_v8, %v685_v4 }
 0x2be   : > { %v539_v12 = vsel %vm450_vm3, %v511_v10, 0.0 }
 0x2bf   : > { %v540_v13 = vadd.f32 %v539_v12, %v538_v11 }
 0x2c1   : > { %541 = vadd.xlane.f32.xlu1 %v540_v13  ;;  %v783_v14 = vpop.eup %782 }
 0x2c2   : > { %v489_v16 = vmul.f32 0.6931472, %v783_v14 }
 0x2c3   : > { %v785_v15 = vpop.eup %784 }
 0x2c4   : > { %v491_v17 = vmul.f32 0.6931472, %v785_v15  ;;  %v492_v18 = vadd.f32 %v489_v16, %v484_v62 }
 0x2c6   : > { %v493_v19 = vadd.f32 %v491_v17, %v485_v63  ;;  %v496_v20 = vsub.f32 %v492_v18, %v494_v0 }
 0x2c8   : > { %v497_v21 = vsub.f32 %v493_v19, %v495_v1  ;;  %v512_v22 = vmul.f32 %v684_v3, %v496_v20 }
 0x2ca   : > { %v513_v23 = vmul.f32 %v685_v4, %v497_v21  ;;  %v514_v24 = vsel %vm450_vm3, %v512_v22, 0.0 }
 0x2cc   : > { %v515_v25 = vsel %vm450_vm3, %v513_v23, 0.0 }
 0x2cd   : > { %v516_v29 = vadd.f32 %v515_v25, %v514_v24 }
 0x2cf   : > { %517 = vadd.xlane.f32.xlu0 %v516_v29 }
 0x2d3   : > { %529 = vadd.xlane.f32.xlu0 %v528_v30 }
 0x34a   : > { %v542_v31 = vpop.xlane.xlu1 %541 }
 0x34b   : > { %v543_v32 = vrot.slane %v542_v31, 4 }
 0x34d   : > { %v544_v33 = vadd.f32 %v543_v32, %v542_v31 }
 0x34f   : > { %v545_v37 = vrot.slane %v544_v33, 2 }
 0x351   : > { %v546_v43 = vadd.f32 %v545_v37, %v544_v33 }
 0x353   : > { %v547_v48 = vrot.slane %v546_v43, 1 }
 0x355   : > { %v548_v51 = vadd.f32 %v547_v48, %v546_v43 }
 0x358   : > { %v518_v34 = vpop.xlane.xlu0 %517 }
 0x359   : > { %v519_v35 = vrot.slane %v518_v34, 4 }
 0x35b   : > { %v520_v36 = vadd.f32 %v519_v35, %v518_v34 }
 0x35c   : > { %v530_v38 = vpop.xlane.xlu0 %529 }
 0x35d   : > { %v521_v39 = vrot.slane %v520_v36, 2  ;;  %v531_v40 = vrot.slane %v530_v38, 4 }
 0x35f   : > { %v532_v41 = vadd.f32 %v531_v40, %v530_v38  ;;  %v522_v42 = vadd.f32 %v521_v39, %v520_v36 }
 0x361   : > { %v533_v44 = vrot.slane %v532_v41, 2  ;;  %v523_v45 = vrot.slane %v522_v42, 1 }
 0x363   : > { %v534_v46 = vadd.f32 %v533_v44, %v532_v41  ;;  %v524_v47 = vadd.f32 %v523_v45, %v522_v42 }
 0x365   : > { %701 = vpush %v524_v47  ;;  %v535_v49 = vrot.slane %v534_v46, 1 }
 0x367   : > { %v536_v50 = vadd.f32 %v535_v49, %v534_v46 }
 0x369   : > { %703 = vpush %v536_v50 }
 0x36a   : > { %705 = vpush %v548_v51 }
 0x396   : > { %s702_s17 = spop %701 }
 0x397   : > { %v557_v55 = vstv %s702_s17 }
 0x39a   : > { %s704_s11 = spop %703 }
 0x39b   : > { %v555_v52 = vstv %s704_s11  ;;  %s706_s12 = spop %705 }
 0x39c   : > { %v553_v53 = vstv %s706_s12 }
 0x39d   : > { %v554_v54 = vsel %vm552_vm10, %v553_v53, 0.0 }
 0x39e   : > { %v556_v56 = vsel %vm551_vm11, %v555_v52, %v554_v54 }
 0x39f   : > { %v558_v57 = vsel %vm550_vm12, %v557_v55, %v556_v56 }
 0x3a0   : > { %559 = vst [vmem:[%s957_s9] sm:$0xff] %v558_v57 }
 0x3a1 PF: > { %s14_s21 = sadd.s32 1, %s840_s21   ;;  %s1021_s15 = smov %s820_s16 }
 0x3a2   : > { %p11_p1 = scmp.ge.s32.totalorder %s14_s21, 18   ;;  %s1022_s16 = smov %s922_s26 }
 0x3a3   : > { %s1023_s17 = smov %s832_s19  ;;  %s1024_s18 = smov %s836_s20 }
 0x3a4   : > { %s1025_s19 = smov %s1028_s22  ;;  %s1026_s20 = smov %s1032_s23 }
 0x3a5   :  { %13 = sbr.rel (!%p11_p1) target bundleno = 6 (0x6), region = 129 }

</bundles_post_ra>
